<compile_context>
chip_gen: v7x
topology: tpu7x:2x2x1
jax: 0.10.0
libtpu: 0.0.40
codegen_flags: <defaults>
</compile_context>

<pallas_src>
import functools

import jax
import jax.numpy as jnp
import numpy as np
from jax import lax
from jax.experimental import pallas as pl
from jax.experimental.pallas import tpu as pltpu


def _euler_kernel(nframes_ref, motion_ref, disp_ref, vis_ref, *, H, W):
    """Integrates the Eulerian motion field destination_frame[b] times for one
    (batch, pixel-tile) grid cell.  State is flat and lane-dense (1, T).  The
    per-frame gather motion[:, iy, ix] is separable: one fused one-hot
    row-select matmul on the MXU (both channels at once) followed by a small
    masked sublane reduction for the column."""
    b = pl.program_id(0)
    t = pl.program_id(1)
    n_frames = nframes_ref[b]                 # per-batch trip count (SMEM scalar)

    T = disp_ref.shape[-1]                    # static pixel-tile width (mult. of 128 or H*W)

    # Stacked, transposed motion (one load per grid step):
    #   m2[c*W + w, r] = motion[b, c, r, w]   -> rows [0:W) = x-channel, [W:2W) = y-channel.
    m2 = motion_ref[0]                        # (2W, H)

    # Base pixel coordinates of this tile, computed in-kernel (no coords input/DMA).
    # Flat pixel index p -> (y, x) = (p // W, p % W); exact in f32 for H*W < 2^24.
    idx = (t * T + lax.broadcasted_iota(jnp.int32, (1, T), 1)).astype(jnp.float32)
    coord_y = jnp.floor(idx / jnp.float32(W))           # (1, T)
    coord_x = idx - coord_y * jnp.float32(W)            # (1, T)

    # Loop-invariant iotas for the separable one-hot gather (hoisted).
    r_iota = lax.broadcasted_iota(jnp.int32, (H, T), 0)   # row id along sublanes
    c_iota = lax.broadcasted_iota(jnp.int32, (W, T), 0)   # col id along sublanes

    def body(_, carry):
        dx, dy, invalid = carry               # (1,T) f32, (1,T) f32, (1,T) f32 in {0,1}

        ix = jnp.round(dx).astype(jnp.int32)  # round-half-even, same as torch.round
        iy = jnp.round(dy).astype(jnp.int32)

        # Fused row select on the MXU (both channels in ONE matmul):
        #   g[c*W + w, p] = motion[c, iy[p], w].
        row_onehot = (iy == r_iota).astype(jnp.float32)                   # (H, T)
        g = jnp.dot(m2, row_onehot, preferred_element_type=jnp.float32)   # (2W, T)

        # Column select: one shared mask, two sublane reductions.
        colmask = (ix == c_iota).astype(jnp.float32)                      # (W, T)
        samp_x = jnp.sum(g[:W] * colmask, axis=0, keepdims=True)          # (1, T)
        samp_y = jnp.sum(g[W:] * colmask, axis=0, keepdims=True)          # (1, T)

        nx = dx + samp_x
        ny = dy + samp_y

        oob = ((nx > (W - 1)) | (nx < 0.0) | (ny > (H - 1)) | (ny < 0.0)).astype(jnp.float32)
        invalid = jnp.maximum(invalid, oob)   # sticky invalid mask
        inv_b = invalid > 0.0

        # Invalid pixels are reset to their original coordinates (as in the reference).
        nx = jnp.where(inv_b, coord_x, nx)
        ny = jnp.where(inv_b, coord_y, ny)
        return nx, ny, invalid

    # Dynamic trip count: only destination_frame[b] iterations are executed.
    dest_x, dest_y, invalid = lax.fori_loop(
        0, n_frames, body,
        (coord_x, coord_y, jnp.zeros((1, T), jnp.float32)),
    )

    inv_b = invalid > 0.0
    sentinel = jnp.float32(max(H, W) + 1)     # torch.max(Tensor([H, W])) + 1
    disp_ref[0, 0:1, :] = jnp.where(inv_b, sentinel, dest_x - coord_x)
    disp_ref[0, 1:2, :] = jnp.where(inv_b, sentinel, dest_y - coord_y)
    vis_ref[0, 0:1, :] = jnp.where(inv_b, jnp.float32(0.0), jnp.float32(1.0))


def _pick_pixel_tile(H, W):
    """Largest lane-dense (multiple-of-128) divisor of H*W whose per-frame
    temporaries fit a conservative VMEM budget, while leaving >= 2 pixel tiles
    (parallel axis for megacore even at batch 1).  Falls back to the full
    flattened field for small / non-128-divisible sizes."""
    hw = H * W
    if hw % 128 != 0 or hw < 256:
        return hw

    def tmp_bytes(t):
        # one-hot (H,T), fused dot result (2W,T) + masked copy, colmask (W,T),
        # iotas, loop state -- all f32.
        return 4 * t * (2 * H + 5 * W + 24)

    budget = 20 * 1024 * 1024
    for cand in (2048, 1024, 512, 384, 256, 128):
        if hw % cand == 0 and 2 * cand <= hw and tmp_bytes(cand) <= budget:
            return cand
    return hw


def _vmem_limit_bytes(H, W, tile):
    """Footprint-derived VMEM limit: double-buffered motion + output tiles +
    per-frame temporaries + headroom, capped at 64 MiB (v7x physical VMEM;
    v5e/v6e have 128 MiB so the cap is always safe)."""
    motion_buf = 2 * (2 * W * H * 4)            # double-buffered (1, 2W, H) f32 motion
    out_buf = 2 * (2 + 1) * tile * 4 * 2        # double-buffered disp + vis tiles
    temps = 4 * tile * (2 * H + 5 * W + 24)     # in-loop temporaries
    need = motion_buf + out_buf + temps + (4 << 20)
    return int(max(32 << 20, min(need, 64 << 20)))


def euler_integration_forward(motion, destination_frame, show_visible_pixels=True):
    """Equivalent of EulerIntegration.forward(motion, destination_frame,
    return_all_frames=False, show_visible_pixels=...)."""
    motion = jnp.asarray(motion, jnp.float32)
    B, C, H, W = motion.shape
    assert C == 2, f"Input motion field should be Bx2xHxW. Given: {motion.shape}"
    HW = H * W

    dest_frames = jnp.asarray(destination_frame, jnp.int32).reshape(B)

    TILE = _pick_pixel_tile(H, W)
    n_tiles = HW // TILE

    # Wrapper-side layout plumbing (once, outside the kernel): transpose each motion
    # channel and stack the channels along rows -> (B, 2W, H), so the per-frame gather
    # is ONE fused MXU matmul with no in-kernel transpose or per-channel issue.
    motion_stacked = jnp.transpose(motion, (0, 1, 3, 2)).reshape(B, 2 * W, H)

    kernel = functools.partial(_euler_kernel, H=H, W=W)

    disp_flat, vis_flat = pl.pallas_call(
        kernel,
        out_shape=(
            jax.ShapeDtypeStruct((B, 2, HW), jnp.float32),
            jax.ShapeDtypeStruct((B, 1, HW), jnp.float32),
        ),
        grid_spec=pltpu.PrefetchScalarGridSpec(
            num_scalar_prefetch=1,
            grid=(B, n_tiles),
            in_specs=[
                # Full stacked motion field resident for every pixel tile of a batch
                # (trajectories roam anywhere); re-DMA'd only when b changes.
                pl.BlockSpec((1, 2 * W, H), lambda b, t, nref: (b, 0, 0)),
            ],
            out_specs=(
                pl.BlockSpec((1, 2, TILE), lambda b, t, nref: (b, 0, t)),
                pl.BlockSpec((1, 1, TILE), lambda b, t, nref: (b, 0, t)),
            ),
        ),
        compiler_params=pltpu.CompilerParams(
            # Pixel tiles are the load-balanced axis (per-batch frame counts differ):
            # shard those across megacore; batch stays "arbitrary" so motion remains
            # resident across the inner tile loop instead of being re-fetched.
            dimension_semantics=("arbitrary", "parallel"),
            vmem_limit_bytes=_vmem_limit_bytes(H, W, TILE),
        ),
    )(dest_frames, motion_stacked)

    displacements = disp_flat.reshape(B, 2, H, W)
    visible_pixels = vis_flat.reshape(B, 1, H, W)
    # TODO(synk): return_all_frames=True (per-intermediate-frame stack) not implemented.
    if show_visible_pixels:
        return displacements, visible_pixels
    return displacements


def _euler_integration_ref(motion, dest_frames):
    """Pure-NumPy reference mirroring the PyTorch code (return_all_frames=False path)."""
    motion = np.asarray(motion, np.float32)
    B, _, H, W = motion.shape
    disp = np.zeros((B, 2, H, W), np.float32)
    vis = np.ones((B, 1, H, W), np.float32)
    coord_x, coord_y = np.meshgrid(np.arange(W, dtype=np.float32),
                                   np.arange(H, dtype=np.float32))
    for b in range(B):
        dx = coord_x.copy()
        dy = coord_y.copy()
        invalid = np.zeros((H, W), bool)
        mx, my = motion[b, 0], motion[b, 1]
        for _ in range(int(dest_frames[b])):
            ix = np.round(dx).astype(np.int64)
            iy = np.round(dy).astype(np.int64)
            dx = dx + mx[iy, ix]
            dy = dy + my[iy, ix]
            oob = (dx > W - 1) | (dx < 0) | (dy > H - 1) | (dy < 0)
            invalid = invalid | oob
            dx = np.where(invalid, coord_x, dx)
            dy = np.where(invalid, coord_y, dy)
        sentinel = np.float32(max(H, W) + 1)
        disp[b, 0] = np.where(invalid, sentinel, dx - coord_x)
        disp[b, 1] = np.where(invalid, sentinel, dy - coord_y)
        vis[b, 0] = (~invalid).astype(np.float32)
    return disp, vis


if __name__ == "__main__":
    key = jax.random.PRNGKey(0)
    B, C, H, W = 2, 2, 16, 16
    # Deterministic synthetic motion field; scaled so some pixels drift out of bounds.
    motion = 0.7 * jax.random.normal(key, (B, C, H, W), dtype=jnp.float32)
    destination_frame = np.array([3, 5], dtype=np.int32)

    disp, vis = euler_integration_forward(motion, destination_frame, show_visible_pixels=True)
    disp = jax.block_until_ready(disp)
    vis = jax.block_until_ready(vis)

    disp_ref, vis_ref = _euler_integration_ref(np.asarray(motion), destination_frame)
    np.testing.assert_allclose(np.asarray(disp), disp_ref, rtol=1e-5, atol=1e-5)
    np.testing.assert_allclose(np.asarray(vis), vis_ref, rtol=0, atol=0)

    print("KERNEL_OK")
</pallas_src>

<mosaic_0001>
module attributes {stable_mosaic.version = 11 : i64} {
  func.func @_euler_kernel(%arg0: i32, %arg1: i32, %arg2: memref<2xi32, #tpu.memory_space<smem>>, %arg3: memref<1x32x16xf32, #tpu.memory_space<vmem>>, %arg4: memref<1x2x128xf32, #tpu.memory_space<vmem>>, %arg5: memref<1x1x128xf32, #tpu.memory_space<vmem>>) attributes {dimension_semantics = [#tpu.dimension_semantics<arbitrary>, #tpu.dimension_semantics<parallel>], iteration_bounds = array<i64: 2, 2>, scalar_prefetch = 1 : i64, scratch_operands = 0 : i64, tpu.core_type = #tpu.core_type<tc>, window_params = [{transform_indices = @transform_0, window_bounds = array<i64: 1, 32, 16>}, {transform_indices = @transform_1, window_bounds = array<i64: 1, 2, 128>}, {transform_indices = @transform_2, window_bounds = array<i64: 1, 1, 128>}]} {
    %0 = arith.index_cast %arg0 : i32 to index
    %1 = memref.load %arg2[%0] : memref<2xi32, #tpu.memory_space<smem>>
    %c0 = arith.constant 0 : index
    %c0_0 = arith.constant 0 : index
    %c0_1 = arith.constant 0 : index
    %2 = vector.load %arg3[%c0, %c0_0, %c0_1] : memref<1x32x16xf32, #tpu.memory_space<vmem>>, vector<1x32x16xf32>
    %3 = vector.shape_cast %2 : vector<1x32x16xf32> to vector<32x16xf32>
    %c128_i32 = arith.constant 128 : i32
    %4 = arith.muli %arg1, %c128_i32 : i32
    %5 = tpu.iota {dimensions = array<i32: 1>} : vector<1x128xi32>
    %6 = vector.broadcast %4 : i32 to vector<1x128xi32>
    %7 = arith.addi %6, %5 : vector<1x128xi32>
    %8 = arith.sitofp %7 : vector<1x128xi32> to vector<1x128xf32>
    %cst = arith.constant 1.600000e+01 : f32
    %9 = vector.broadcast %cst : f32 to vector<1x128xf32>
    %10 = arith.divf %8, %9 : vector<1x128xf32>
    %11 = math.floor %10 : vector<1x128xf32>
    %cst_2 = arith.constant 1.600000e+01 : f32
    %12 = vector.broadcast %cst_2 : f32 to vector<1x128xf32>
    %13 = arith.mulf %11, %12 : vector<1x128xf32>
    %14 = arith.subf %8, %13 : vector<1x128xf32>
    %15 = tpu.iota {dimensions = array<i32: 0>} : vector<16x128xi32>
    %16 = tpu.iota {dimensions = array<i32: 0>} : vector<16x128xi32>
    %cst_3 = arith.constant 0.000000e+00 : f32
    %17 = vector.broadcast %cst_3 : f32 to vector<1x128xf32>
    %c0_i32 = arith.constant 0 : i32
    %18 = arith.subi %1, %c0_i32 : i32
    %19 = arith.addi %c0_i32, %18 : i32
    %c1_i32 = arith.constant 1 : i32
    %20:3 = scf.for %arg6 = %c0_i32 to %19 step %c1_i32 iter_args(%arg7 = %14, %arg8 = %11, %arg9 = %17) -> (vector<1x128xf32>, vector<1x128xf32>, vector<1x128xf32>)  : i32 {
      %41 = math.roundeven %arg7 : vector<1x128xf32>
      %42 = arith.fptosi %41 : vector<1x128xf32> to vector<1x128xi32>
      %43 = math.roundeven %arg8 : vector<1x128xf32>
      %44 = arith.fptosi %43 : vector<1x128xf32> to vector<1x128xi32>
      %45 = vector.broadcast %44 : vector<1x128xi32> to vector<16x128xi32>
      %46 = arith.cmpi eq, %45, %15 : vector<16x128xi32>
      %47 = arith.extui %46 : vector<16x128xi1> to vector<16x128xi32>
      %48 = arith.sitofp %47 : vector<16x128xi32> to vector<16x128xf32>
      %cst_17 = arith.constant dense<0.000000e+00> : vector<32x128xf32>
      %49 = tpu.matmul %3, %48, %cst_17 {dimension_numbers = #tpu.dot_dimension_numbers<[1], [0], [0], [1], [0, 0, 1, 1], [], []>} : vector<32x16xf32>, vector<16x128xf32>, vector<32x128xf32> -> vector<32x128xf32>
      %50 = vector.broadcast %42 : vector<1x128xi32> to vector<16x128xi32>
      %51 = arith.cmpi eq, %50, %16 : vector<16x128xi32>
      %52 = arith.extui %51 : vector<16x128xi1> to vector<16x128xi32>
      %53 = arith.sitofp %52 : vector<16x128xi32> to vector<16x128xf32>
      %54 = vector.extract_strided_slice %49 {offsets = [0, 0], sizes = [16, 128], strides = [1, 1]} : vector<32x128xf32> to vector<16x128xf32>
      %55 = arith.mulf %54, %53 : vector<16x128xf32>
      %cst_18 = arith.constant dense<0.000000e+00> : vector<128xf32>
      %56 = vector.multi_reduction <add>, %55, %cst_18 [0] : vector<16x128xf32> to vector<128xf32>
      %57 = vector.shape_cast %56 : vector<128xf32> to vector<1x128xf32>
      %58 = vector.extract_strided_slice %49 {offsets = [16, 0], sizes = [16, 128], strides = [1, 1]} : vector<32x128xf32> to vector<16x128xf32>
      %59 = arith.mulf %58, %53 : vector<16x128xf32>
      %cst_19 = arith.constant dense<0.000000e+00> : vector<128xf32>
      %60 = vector.multi_reduction <add>, %59, %cst_19 [0] : vector<16x128xf32> to vector<128xf32>
      %61 = vector.shape_cast %60 : vector<128xf32> to vector<1x128xf32>
      %62 = arith.addf %arg7, %57 : vector<1x128xf32>
      %63 = arith.addf %arg8, %61 : vector<1x128xf32>
      %cst_20 = arith.constant 1.500000e+01 : f32
      %64 = vector.broadcast %cst_20 : f32 to vector<1x128xf32>
      %65 = arith.cmpf ogt, %62, %64 : vector<1x128xf32>
      %cst_21 = arith.constant 0.000000e+00 : f32
      %66 = vector.broadcast %cst_21 : f32 to vector<1x128xf32>
      %67 = arith.cmpf olt, %62, %66 : vector<1x128xf32>
      %68 = arith.ori %65, %67 : vector<1x128xi1>
      %cst_22 = arith.constant 1.500000e+01 : f32
      %69 = vector.broadcast %cst_22 : f32 to vector<1x128xf32>
      %70 = arith.cmpf ogt, %63, %69 : vector<1x128xf32>
      %71 = arith.ori %68, %70 : vector<1x128xi1>
      %cst_23 = arith.constant 0.000000e+00 : f32
      %72 = vector.broadcast %cst_23 : f32 to vector<1x128xf32>
      %73 = arith.cmpf olt, %63, %72 : vector<1x128xf32>
      %74 = arith.ori %71, %73 : vector<1x128xi1>
      %75 = arith.extui %74 : vector<1x128xi1> to vector<1x128xi32>
      %76 = arith.sitofp %75 : vector<1x128xi32> to vector<1x128xf32>
      %77 = arith.maximumf %arg9, %76 : vector<1x128xf32>
      %cst_24 = arith.constant 0.000000e+00 : f32
      %78 = vector.broadcast %cst_24 : f32 to vector<1x128xf32>
      %79 = arith.cmpf ogt, %77, %78 : vector<1x128xf32>
      %80 = arith.select %79, %14, %62 : vector<1x128xi1>, vector<1x128xf32>
      %81 = arith.select %79, %11, %63 : vector<1x128xi1>, vector<1x128xf32>
      scf.yield %80, %81, %77 : vector<1x128xf32>, vector<1x128xf32>, vector<1x128xf32>
    }
    %cst_4 = arith.constant 0.000000e+00 : f32
    %21 = vector.broadcast %cst_4 : f32 to vector<1x128xf32>
    %22 = arith.cmpf ogt, %20#2, %21 : vector<1x128xf32>
    %23 = arith.subf %20#0, %14 : vector<1x128xf32>
    %cst_5 = arith.constant 1.700000e+01 : f32
    %24 = vector.broadcast %cst_5 : f32 to vector<1x128xf32>
    %25 = arith.select %22, %24, %23 : vector<1x128xi1>, vector<1x128xf32>
    %c0_6 = arith.constant 0 : index
    %c0_7 = arith.constant 0 : index
    %c0_8 = arith.constant 0 : index
    %26 = vector.load %arg4[%c0_6, %c0_7, %c0_8] : memref<1x2x128xf32, #tpu.memory_space<vmem>>, vector<1x1x128xf32>
    %27 = vector.shape_cast %26 : vector<1x1x128xf32> to vector<1x128xf32>
    %28 = vector.shape_cast %25 : vector<1x128xf32> to vector<1x1x128xf32>
    tpu.vector_store %arg4[%c0_6, %c0_7, %c0_8], %28 {strides = array<i32>} : memref<1x2x128xf32, #tpu.memory_space<vmem>>, vector<1x1x128xf32>,
    %29 = arith.subf %20#1, %11 : vector<1x128xf32>
    %cst_9 = arith.constant 1.700000e+01 : f32
    %30 = vector.broadcast %cst_9 : f32 to vector<1x128xf32>
    %31 = arith.select %22, %30, %29 : vector<1x128xi1>, vector<1x128xf32>
    %c0_10 = arith.constant 0 : index
    %c1 = arith.constant 1 : index
    %c0_11 = arith.constant 0 : index
    %32 = vector.load %arg4[%c0_10, %c1, %c0_11] : memref<1x2x128xf32, #tpu.memory_space<vmem>>, vector<1x1x128xf32>
    %33 = vector.shape_cast %32 : vector<1x1x128xf32> to vector<1x128xf32>
    %34 = vector.shape_cast %31 : vector<1x128xf32> to vector<1x1x128xf32>
    tpu.vector_store %arg4[%c0_10, %c1, %c0_11], %34 {strides = array<i32>} : memref<1x2x128xf32, #tpu.memory_space<vmem>>, vector<1x1x128xf32>,
    %cst_12 = arith.constant 0.000000e+00 : f32
    %cst_13 = arith.constant 1.000000e+00 : f32
    %35 = vector.broadcast %cst_12 : f32 to vector<1x128xf32>
    %36 = vector.broadcast %cst_13 : f32 to vector<1x128xf32>
    %37 = arith.select %22, %35, %36 : vector<1x128xi1>, vector<1x128xf32>
    %c0_14 = arith.constant 0 : index
    %c0_15 = arith.constant 0 : index
    %c0_16 = arith.constant 0 : index
    %38 = vector.load %arg5[%c0_14, %c0_15, %c0_16] : memref<1x1x128xf32, #tpu.memory_space<vmem>>, vector<1x1x128xf32>
    %39 = vector.shape_cast %38 : vector<1x1x128xf32> to vector<1x128xf32>
    %40 = vector.shape_cast %37 : vector<1x128xf32> to vector<1x1x128xf32>
    tpu.vector_store %arg5[%c0_14, %c0_15, %c0_16], %40 {strides = array<i32>} : memref<1x1x128xf32, #tpu.memory_space<vmem>>, vector<1x1x128xf32>,
    return
  }
  func.func @transform_0(%arg0: i32, %arg1: i32, %arg2: memref<2xi32, #tpu.memory_space<smem>>) -> (i32, i32, i32) {
    %c0_i32 = arith.constant 0 : i32
    %c0_i32_0 = arith.constant 0 : i32
    %c0_i32_1 = arith.constant 0 : i32
    return %arg0, %c0_i32, %c0_i32_0 : i32, i32, i32
  }
  func.func @transform_1(%arg0: i32, %arg1: i32, %arg2: memref<2xi32, #tpu.memory_space<smem>>) -> (i32, i32, i32) {
    %c0_i32 = arith.constant 0 : i32
    %c0_i32_0 = arith.constant 0 : i32
    return %arg0, %c0_i32, %arg1 : i32, i32, i32
  }
  func.func @transform_2(%arg0: i32, %arg1: i32, %arg2: memref<2xi32, #tpu.memory_space<smem>>) -> (i32, i32, i32) {
    %c0_i32 = arith.constant 0 : i32
    %c0_i32_0 = arith.constant 0 : i32
    return %arg0, %c0_i32, %arg1 : i32, i32, i32
  }
}

</mosaic_0001>

<bundles_post_ra>
// kernel: tpu_custom_call.1
= control target key start
LH: loop header
LB: loop body
LE: loop exit
PB: predicated region body
PF: predicated region fallthrough
CT: control target
= control target key end

     0   :  { %s1175_s0 = inlined_call_operand.vmem [shape: s32[2], index: 0, kind: input, shape index: {}]   ;;  %s1176_s1 = inlined_call_operand.vmem [shape: f32[2,32,16], index: 1, kind: input, shape index: {}]   ;;  %s1177_s2 = inlined_call_operand.hbm [shape: f32[2,2,256], index: 2, kind: output, shape index: {0}]   ;;  %s1178_s3 = inlined_call_operand.hbm [shape: f32[2,1,256], index: 3, kind: output, shape index: {1}]  }
   0x1   :  { %s9_s14 = sshll.u32 %s1175_s0, 4  ;;  %s10_s14 = int_to_ptr.vmem [resolvable:$true] %s9_s14 }
   0x2   :  { %s701_s15 = scalar_lea.vmem %s10_s14, 16  ;;  %p706_p1 = scmp.lt.s32.totalorder %s10_s14, %s10_s14 }
   0x3   :  { %p702_p0 = scmp.ne.s32.totalorder %s10_s14, %s701_s15  ;;  %p707_p2 = scmp.lt.s32.totalorder %s701_s15, %s701_s15 }
   0x5   :  { %p708_p3 = por %p707_p2, %p706_p1 }
   0x7   :  { %p709_p4 = pnand %p708_p3, %p702_p0 }
   0x9   :  { %712 = shalt.err (!%p709_p4)  }
   0xa   :  { %s899_s16 = smov [#allocation3]  }
   0xb   :  { %12 = dma.vmem_to_smem %s10_s14, 16, %s899_s16, [#allocation2] }
   0xc   :  { %829 = dma.done.wait [#allocation2], 16 }
   0xd   :  { %830 = vsyncadd [#allocation2], 4294967280 }
   0xe   :  { %14 = sfence }
   0xf   :  { %15 = vsyncpa [#allocation5], 0 }
  0x10   :  { %17 = vsyncpa [#allocation5 + $0x1], 0 }
  0x11   :  { %18 = vsyncpa [#allocation7], 0 }
  0x12   :  { %20 = vsyncpa [#allocation7 + $0x1], 0  ;;  %s928_s17 = smov 0   ;;  %s930_s0 = smov 0  }
  0x13   :  { %s932_s18 = smov 0   ;;  %s934_s19 = smov 0  }
  0x14   :  { %s936_s20 = smov 0   ;;  %s938_s21 = smov 0  }
  0x15   :  { %s940_s22 = smov 0   ;;  %s942_s23 = smov 0  }
  0x16 LB: > { %s508_s24 = sadd.s32 4294967295, %s869_s23   ;;  %s509_s25 = sadd.s32 4294967294, %s869_s23   ;;  %s869_s23 = sphi %s942_s23, %s26_s23   ;;  %s865_s22 = sphi %s940_s22, %s1197_s22   ;;  %s861_s21 = sphi %s938_s21, %s1196_s21   ;;  %s857_s20 = sphi %s936_s20, %s1195_s20   ;;  %s853_s19 = sphi %s934_s19, %s1194_s19   ;;  %s849_s18 = sphi %s932_s18, %s1193_s18   ;;  %s845_s0 = sphi %s930_s0, %s1192_s0   ;;  %s841_s17 = sphi %s928_s17, %s1191_s17  }
  0x17   : > { %s35_s26 = sadd.s32 1, %s861_s21  ;;  %s38_s27 = sadd.s32 1, %s865_s22 }
  0x18   : > { %p36_p5 = scmp.ge.s32.totalorder %s35_s26, 2  ;;  %p83_p6 = scmp.ne.s32.totalorder %s849_s18, %s845_s0 }
  0x19   : > { %p84_p7 = scmp.eq.s32.totalorder %s508_s24, 3  ;;  %p89_p10 = scmp.ne.s32.totalorder %s845_s0, %s841_s17 }
  0x1a   : > { %s1199_s26 = smov (%p36_p5, %s35_s26), 0  ;;  %s1201_s27 = smov (!%p36_p5, %s38_s27), %s865_s22 }
  0x1b   : > { %s69_s28 = ssub.s32 %s861_s21, %s1199_s26  ;;  %p979_p8 = por %p84_p7, %p83_p6 }
  0x1c   : > { %p40_p9 = scmp.ge.s32.totalorder %s1201_s27, 2  ;;  %p90_p11 = scmp.eq.s32.totalorder %s509_s25, 3 }
  0x1d   : > { %p512_p12 = scmp.ge.s32.totalorder %s869_s23, 1  ;;  %p144_p0 = scmp.lt.s32.totalorder %s869_s23, 5 }
  0x1e   : > { %s1203_s27 = smov (%p40_p9, %s1201_s27), 0  ;;  %p988_p13 = por %p90_p11, %p89_p10 }
  0x1f   : > { %s68_s4 = ssub.s32 %s865_s22, %s1203_s27  ;;  %s73_s5 = sadd.s32 1, %s849_s18 }
  0x20   : > { %s70_s6 = sor.u32 %s69_s28, %s68_s4  ;;  %p145_p1 = pnand %p512_p12, %p144_p0 }
  0x21   : > { %p71_p2 = scmp.eq.s32.totalorder %s70_s6, 0  ;;  %s1000_s8 = sand.u32 (!%p145_p1), 1, %s845_s0   ;;  %v181_v0 = vlaneseq (!%p145_p1)  ;;  %v1034_v15 = vmov (!%p145_p1), 0.0  }
  0x22   : > { %148 = sbr.rel (%p145_p1) target bundleno = 351 (0x15f), region = 24  ;;  %p170_p3 = scmp.lt.s32.totalorder (!%p145_p1), %s857_s20, 1 }
  0x23   : > { %s997_s7 = scalar_select %p71_p2, %s849_s18, %s73_s5  }
  0x24   : > { %s513_s9 = sshll.u32 (!%p145_p1), %s1000_s8, 1  ;;  %s1005_s10 = sld [smem:[#allocation3 + %s857_s20]] (!%p145_p1)  ;;  %v182_v1 = vand.u32 (!%p145_p1), 127, %v181_v0  ;;  %v1007_v2 = vshrl.u32 (!%p145_p1), %v181_v0, 7 }
  0x25   : > { %s516_s12 = sshll.u32 (!%p145_p1), %s853_s19, 7  ;;  %s1030_s24 = scalar_lea.vmem (!%p145_p1), [#allocation4], %s513_s9 }
  0x26   : > { %v1012_v3 = vadd.s32 (!%p145_p1), 8, %v1007_v2  ;;  %v183_v4 = vstv (!%p145_p1), %s516_s12  ;;  %s169_s25 = scalar_lea.vmem (!%p145_p1), [#allocation6], %s1000_s8 }
  0x27   : > { %v184_v5 = vadd.s32 (!%p145_p1), %v183_v4, %v182_v1 }
  0x29   : > { %s171_s11 = scalar_select %p170_p3, %s857_s20, 1  ;;  %v185_v10 = vcvt.s32.f32 %v184_v5 }
  0x2a   : > { %p517_p4 = scmp.le.s32.totalorder %s1005_s10, 0 }
  0x2b   : > { %s536_s13 = sshll.u32 %s171_s11, 5  ;;  %v187_v11 = vmul.f32 0.0625, %v185_v10  ;;  %v1042_v18 = vmov (!%p517_p4), 0.0   ;;  %s1050_s28 = smov (!%p517_p4), 0  }
  0x2c   : > { %s174_s16 = scalar_lea.vmem %s1176_s1, %s536_s13 }
  0x2d   : > { %v1017_v6 = vld [vmem:[%s174_s16] sm:$0xff]  ;;  %v1019_v7 = vld [vmem:[%s174_s16 + $0x8] sm:$0xff]  ;;  %v1021_v8 = vld [vmem:[%s174_s16 + $0x10] sm:$0xff]  ;;  %v1025_v12 = vfloor.f32 %v187_v11   ;;  %458 = sbr.rel (%p517_p4) target bundleno = 301 (0x12d), region = 77 }
  0x2e   : > { %v1023_v9 = vld [vmem:[%s174_s16 + $0x18] sm:$0xff] }
  0x2f   : > { %v189_v13 = vmul.f32 16.0, %v1025_v12  ;;  %v1181_v16 = vmov %v1025_v12  ;;  %v1183_v19 = vmov (!%p517_p4), %v1025_v12 }
  0x31   : > { %v1028_v14 = vsub.f32 %v185_v10, %v189_v13  }
  0x33   : > { %v1182_v17 = vmov %v1028_v14  ;;  %v1184_v20 = vmov (!%p517_p4), %v1028_v14 }
  0x34 LB: >> { %vm211_vm0 = vcmask 130048   ;;  %v564_v21 = vcvt.f32.s32 %v877_v19  ;;  %v900_v22 = vmov 1.0|1.0   ;;  %v561_v23 = vcvt.f32.s32 %v881_v20  ;;  %s197_s28 = sadd.s32 1, %s885_s28   ;;  %s885_s28 = sphi %s1050_s28, %s197_s28   ;;  %v881_v20 = vphi %v1184_v20, %v1187_v20   ;;  %v877_v19 = vphi %v1183_v19, %v1186_v19   ;;  %v873_v18 = vphi %v1042_v18, %v1185_v18  }
  0x35   : >> { %547 = vmatprep.mubr.msk.f32.mxu0 %vm211_vm0, %v1017_v6  ;;  %550 = vmatprep.mubr.msk.f32.mxu1 %vm211_vm0, %v1021_v8  ;;  %v901_v24 = vmov 0.0   ;;  %p196_p5 = scmp.ge.s32.totalorder %s197_s28, %s1005_s10 }
  0x36   : >> { %vm205_vm1 = vcmp.eq.s32.totalorder %v564_v21, %v1007_v2  ;;  %vm206_vm2 = vcmp.eq.s32.totalorder %v564_v21, %v1012_v3  ;;  %vm310_vm4 = vcmp.eq.s32.totalorder %v561_v23, %v1012_v3  ;;  %vm309_vm5 = vcmp.eq.s32.totalorder %v561_v23, %v1007_v2 }
  0x37   : >> { %vm553_vm3 = vmpackc.low %vm206_vm2, %vm205_vm1  ;;  %v527_v25 = vsel %vm310_vm4, 1.0, %v901_v24  ;;  %v526_v26 = vsel %vm309_vm5, 1.0, %v901_v24 }
  0x38   : >> { %554 = vmatprep.subr.msk.bf16.mxu0 %vm553_vm3, %v900_v22  ;;  %557 = vmatprep.subr.msk.bf16.mxu1 %vm553_vm3, %v900_v22 }
  0x39   : >> { %556 = vmatpush3.bf16.msk.msra.mxu0 %vm553_vm3, %v900_v22  ;;  %558 = vmatpush3.bf16.msk.msra.mxu1 %vm553_vm3, %v900_v22 }
  0x3c   : >> { %548 = vmatmul.mubr.msk.f32.vlgmr.msra.gmra.mrb[0].mxu0 %vm211_vm0, %v1019_v7  ;;  %551 = vmatmul.mubr.msk.f32.vlgmr.msra.gmra.mrb[0].mxu1 %vm211_vm0, %v1023_v9 }
 0x10f   : >> { %v549_v27 = vpop.f32.mrb[0].mxu0  ;;  %v552_v28 = vpop.f32.mrb[0].mxu1 }
 0x110   : >> { %v316_v29 = vmul.f32 %v549_v27, %v527_v25  ;;  %v325_v30 = vmul.f32 %v552_v28, %v527_v25  ;;  %v290_v31 = vpop.f32.mrb[1].mxu0  ;;  %v300_v32 = vpop.f32.mrb[1].mxu1 }
 0x111   : >> { %v315_v33 = vmul.f32 %v526_v26, %v290_v31  ;;  %v324_v34 = vmul.f32 %v526_v26, %v300_v32 }
 0x113   : >> { %v317_v35 = vadd.f32 %v316_v29, %v315_v33  ;;  %v326_v36 = vadd.f32 %v325_v30, %v324_v34 }
 0x115   : >> { %v318_v37 = vrot.slane %v317_v35, 4  ;;  %v327_v38 = vrot.slane %v326_v36, 4 }
 0x117   : >> { %v319_v39 = vadd.f32 %v318_v37, %v317_v35  ;;  %v328_v40 = vadd.f32 %v327_v38, %v326_v36 }
 0x119   : >> { %v320_v41 = vrot.slane %v319_v39, 2  ;;  %v329_v42 = vrot.slane %v328_v40, 2 }
 0x11b   : >> { %v321_v43 = vadd.f32 %v320_v41, %v319_v39  ;;  %v330_v44 = vadd.f32 %v329_v42, %v328_v40 }
 0x11d   : >> { %v322_v45 = vrot.slane %v321_v43, 1  ;;  %v331_v46 = vrot.slane %v330_v44, 1 }
 0x11f   : >> { %v323_v47 = vadd.f32 %v322_v45, %v321_v43  ;;  %v332_v48 = vadd.f32 %v331_v46, %v330_v44 }
 0x121   : >> { %v333_v49 = vadd.f32 %v881_v20, %v323_v47  ;;  %v334_v50 = vadd.f32 %v877_v19, %v332_v48 }
 0x123   : >> { %vm335_vm6 = vcmp.gt.f32.partialorder %v333_v49, 15.0  ;;  %vm336_vm7 = vcmp.lt.f32.partialorder %v333_v49, 0.0  ;;  %vm338_vm8 = vcmp.gt.f32.partialorder %v334_v50, 15.0  ;;  %vm340_vm11 = vcmp.lt.f32.partialorder %v334_v50, 0.0 }
 0x124   : >> { %vm337_vm9 = vmor %vm335_vm6, %vm336_vm7 }
 0x125   : >> { %vm339_vm10 = vmor %vm337_vm9, %vm338_vm8 }
 0x126   : >> { %vm341_vm12 = vmor %vm339_vm10, %vm340_vm11  ;;  %199 = sbr.rel (!%p196_p5) target bundleno = 52 (0x34), region = 83 }
 0x127   : >> { %v528_v51 = vsel %vm341_vm12, 1.0, %v901_v24 }
 0x128   : >> { %v344_v52 = vmax.f32 %v873_v18, %v528_v51  }
 0x12a   : >> { %vm345_vm13 = vcmp.gt.f32.partialorder %v344_v52, 0.0  ;;  %v1185_v18 = vmov %v344_v52  ;;  %v1188_v15 = vmov (%p196_p5), %v344_v52 }
 0x12b   : >> { %v346_v53 = vsel %vm345_vm13, %v1028_v14, %v333_v49   ;;  %v347_v54 = vsel %vm345_vm13, %v1025_v12, %v334_v50  }
 0x12c   : >> { %v1186_v19 = vmov %v347_v54  ;;  %v1187_v20 = vmov %v346_v53  ;;  %v1189_v16 = vmov (%p196_p5), %v347_v54  ;;  %v1190_v17 = vmov (%p196_p5), %v346_v53 }
 0x12d PF: > { %vm348_vm14 = vcmp.gt.f32.partialorder %v889_v15, 0.0  ;;  %v349_v55 = vsub.f32 %v897_v17, %v1028_v14  ;;  %v352_v56 = vsub.f32 %v893_v16, %v1025_v12  ;;  %s530_s4 = sshll.u32 %s857_s20, 1  ;;  %v902_v57 = vmov 1.0   ;;  %s377_s6 = sshll.u32 %s1030_s24, 4  ;;  %v897_v17 = vphi %v1182_v17, %v1190_v17   ;;  %v893_v16 = vphi %v1181_v16, %v1189_v16   ;;  %v889_v15 = vphi %v1034_v15, %v1188_v15   ;;  %s1097_s6 = int_to_ptr.vmem [resolvable:$true] %s377_s6 }
 0x12e   : > { %v355_v58 = vsel %vm348_vm14, 0.0, %v902_v57  ;;  %s1091_s5 = sadd.s32 %s853_s19, %s530_s4  ;;  %s358_s19 = scalar_lea.sflag [#allocation5], %s1000_s8 }
 0x12f   : > { %v350_v59 = vsel %vm348_vm14, 17.0, %v349_v55  ;;  %v353_v60 = vsel %vm348_vm14, 17.0, %v352_v56  ;;  %356 = vst [vmem:[%s169_s25] sm:$0x1] %v355_v58  ;;  %s531_s9 = sshll.u32 %s1091_s5, 5  ;;  %s713_s12 = scalar_lea.vmem %s1097_s6, 32 }
 0x130   : > { %351 = vst [vmem:[%s1030_s24] sm:$0x1] %v350_v59  ;;  %354 = vst [vmem:[%s1030_s24 + $0x1] sm:$0x1] %v353_v60  ;;  %s375_s11 = scalar_lea.hbm %s1177_s2, %s531_s9  ;;  %p714_p6 = scmp.ne.s32.totalorder %s1097_s6, %s713_s12 }
 0x131   : > { %s903_s13 = smov [#allocation4]  }
 0x132   : > { %p715_p7 = pnand %p714_p6, %p979_p8  ;;  %s717_s14 = sshll.u32 %s903_s13, 4  ;;  %s718_s14 = int_to_ptr.vmem [resolvable:$false] %s717_s14 }
 0x133   : > { %s719_s15 = scalar_lea.vmem %s718_s14, 64  ;;  %p720_p10 = scmp.lt.s32.totalorder %s1097_s6, %s718_s14 }
 0x134   : > { %p716_p9 = pneg %p715_p7  ;;  %p721_p11 = scmp.lt.s32.totalorder %s719_s15, %s713_s12 }
 0x136   : > { %p722_p12 = por %p721_p11, %p720_p10 }
 0x138   : > { %p723_p0 = pnand %p722_p12, %p716_p9 }
 0x13a   : > { %726 = shalt.err (!%p723_p0)
}
 0x13b   : > { %s727_s16 = scalar_lea.hbm %s375_s11, 32  ;;  %s731_s4 = scalar_lea.hbm %s1177_s2, 128 }
 0x13c   : > { %p728_p1 = scmp.ne.s32.totalorder %s375_s11, %s727_s16  ;;  %p732_p4 = scmp.lt.u32.totalorder %s375_s11, %s1177_s2 }
 0x13d   : > { %p733_p5 = scmp.lt.u32.totalorder %s731_s4, %s727_s16  ;;  %p735_p7 = scmp.lt.u32.totalorder %s727_s16, %s375_s11 }
 0x13e   : > { %p729_p2 = pnand %p728_p1, %p979_p8 }
 0x13f   : > { %p734_p6 = por %p733_p5, %p732_p4 }
 0x140   : > { %p730_p3 = pneg %p729_p2 }
 0x141   : > { %p736_p10 = por %p735_p7, %p734_p6 }
 0x143   : > { %p737_p9 = pnand %p736_p10, %p730_p3 }
 0x145   : > { %740 = shalt.err (!%p737_p9)
}
 0x146   : > { %565 = dma.vmem_to_hbm [thread:$0]  (%p979_p8), %s1097_s6, 32, %s375_s11, %s358_s19  }
 0x147   : > { %s533_s10 = sshll.u32 %s1091_s5, 4  ;;  %s392_s12 = sshll.u32 %s169_s25, 4  ;;  %s393_s12 = int_to_ptr.vmem [resolvable:$true] %s392_s12 }
 0x148   : > { %s1127_s15 = scalar_lea.hbm %s1178_s3, %s533_s10  ;;  %s363_s16 = scalar_lea.sflag [#allocation7], %s1000_s8 }
 0x149   : > { %s741_s24 = scalar_lea.vmem %s393_s12, 16  ;;  %s904_s28 = smov [#allocation6]  }
 0x14a   : > { %p742_p11 = scmp.ne.s32.totalorder %s393_s12, %s741_s24  ;;  %s745_s4 = sshll.u32 %s904_s28, 4  ;;  %s746_s4 = int_to_ptr.vmem [resolvable:$false] %s745_s4 }
 0x14b   : > { %s747_s9 = scalar_lea.vmem %s746_s4, 32  ;;  %p748_p1 = scmp.lt.s32.totalorder %s393_s12, %s746_s4 }
 0x14c   : > { %p743_p12 = pnand %p742_p11, %p979_p8  ;;  %p749_p2 = scmp.lt.s32.totalorder %s747_s9, %s741_s24 }
 0x14e   : > { %p744_p0 = pneg %p743_p12  ;;  %p750_p3 = por %p749_p2, %p748_p1 }
 0x150   : > { %p751_p4 = pnand %p750_p3, %p744_p0 }
 0x152   : > { %754 = shalt.err (!%p751_p4)
}
 0x153   : > { %s755_s8 = scalar_lea.hbm %s1127_s15, 16  ;;  %s759_s6 = scalar_lea.hbm %s1178_s3, 64 }
 0x154   : > { %p756_p5 = scmp.ne.s32.totalorder %s1127_s15, %s755_s8  ;;  %p760_p10 = scmp.lt.u32.totalorder %s1127_s15, %s1178_s3 }
 0x155   : > { %p761_p9 = scmp.lt.u32.totalorder %s759_s6, %s755_s8  ;;  %p763_p12 = scmp.lt.u32.totalorder %s755_s8, %s1127_s15 }
 0x156   : > { %p757_p6 = pnand %p756_p5, %p979_p8 }
 0x157   : > { %p762_p11 = por %p761_p9, %p760_p10 }
 0x158   : > { %p758_p7 = pneg %p757_p6 }
 0x159   : > { %p764_p0 = por %p763_p12, %p762_p11 }
 0x15b   : > { %p765_p1 = pnand %p764_p0, %p758_p7 }
 0x15d   : > { %768 = shalt.err (!%p765_p1)
}
 0x15e   : > { %566 = dma.vmem_to_hbm [thread:$0]  (%p979_p8), %s393_s12, 16, %s1127_s15, %s363_s16  }
 0x15f PF: > { %p576_p2 = scmp.ge.s32.totalorder %s869_s23, 2  ;;  %s404_s20 = sand.u32 1, %s841_s17  }
 0x160   : > { %s405_s10 = scalar_lea.sflag [#allocation5], %s404_s20 }
 0x161   : > { %p570_p3 = pnand %p576_p2, %p988_p13 }
 0x163   : > { %832 = dma.done.wait (!%p570_p3), %s405_s10, 32  }
 0x164   : > { %834 = vsyncadd (!%p570_p3), %s405_s10, 4294967264  ;;  %s414_s13 = scalar_lea.sflag [#allocation7], %s404_s20 }
 0x165   : > { %836 = dma.done.wait (!%p570_p3), %s414_s13, 16  }
 0x166   : > { %838 = vsyncadd (!%p570_p3), %s414_s13, 4294967280  ;;  %s26_s23 = sadd.s32 1, %s869_s23   ;;  %s1191_s17 = smov %s845_s0 }
 0x167   : > { %p23_p4 = scmp.ge.s32.totalorder %s26_s23, 6   ;;  %s1192_s0 = smov %s849_s18 }
 0x168   : > { %s1193_s18 = smov %s997_s7  ;;  %s1194_s19 = smov %s861_s21 }
 0x169   : > { %s1195_s20 = smov %s865_s22  ;;  %s1196_s21 = smov %s1199_s26 }
 0x16a   : > { %s1197_s22 = smov %s1203_s27  ;;  %25 = sbr.rel (!%p23_p4) target bundleno = 22 (0x16), region = 94 }
 0x171   :  { %418 = vsyncpa [#allocation5], 1 }
 0x172   :  { %420 = vsyncpa [#allocation5 + $0x1], 1 }
 0x173   :  { %421 = vsyncpa [#allocation7], 1 }
 0x174   :  { %423 = vsyncpa [#allocation7 + $0x1], 1 }

</bundles_post_ra>
